<compile_context>
chip_gen: v7x
topology: tpu7x:2x2x1
jax: 0.10.0
libtpu: 0.0.40
codegen_flags: <defaults>
</compile_context>

<pallas_src>
import functools

import jax
import jax.numpy as jnp
from jax.experimental import pallas as pl
from jax.experimental.pallas import tpu as pltpu

LANE = 128
SUBLANE = 8


def _round_up(n, m):
    return ((n + m - 1) // m) * m


@functools.lru_cache(maxsize=1)
def _vmem_capacity_bytes():
    # Physical VMEM per TensorCore: 128 MiB on v5e/v6e, 64 MiB on v7x.
    try:
        return int(pltpu.get_tpu_info().vmem_capacity_bytes)
    except Exception:
        return 64 * 1024 * 1024  # conservative fallback (v7x-sized)


def _logreg_kernel(x_ref, w_ref, b_ref, o_ref):
    # x: (tm, D), w: (D, Cp) bf16, b: (1, Cp) f32, o: (tm, Cp)
    x = x_ref[...].astype(w_ref.dtype)  # no-op if the caller already feeds bf16
    acc = jnp.dot(x, w_ref[...], preferred_element_type=jnp.float32)
    o_ref[...] = (acc + b_ref[...]).astype(o_ref.dtype)


def prepare_params(weight, bias, compute_dtype=jnp.bfloat16):
    """One-time parameter prep (per model, NOT per forward call).

    weight: (C, D) PyTorch layout, bias: (C,).
    Returns W^T cast to compute_dtype and zero-padded to (D, Cp), plus bias
    zero-padded to (1, Cp) in f32, with Cp = round_up(C, 128) so the kernel's
    output stores are lane-dense.
    """
    C, D = weight.shape
    c_pad = _round_up(C, LANE)
    w_t = jnp.zeros((D, c_pad), dtype=compute_dtype)
    w_t = w_t.at[:, :C].set(weight.T.astype(compute_dtype))
    b2 = jnp.zeros((1, c_pad), dtype=jnp.float32)
    b2 = b2.at[0, :C].set(bias.astype(jnp.float32))
    return w_t, b2


def _choose_block_b(B, D, c_pad, x_bytes, w_bytes, out_bytes, budget_bytes):
    """Pick a batch tile that (a) fits double-buffered x/out blocks plus the
    resident (double-buffered) W/bias tiles in the VMEM budget, (b) does not
    overshoot B, and (c) leaves >= 2 grid steps so both v7x TensorCores get
    work under dimension_semantics=("parallel",)."""
    # TODO(synk): for very large D, add a K ("arbitrary") grid axis with an f32
    # VMEM accumulator instead of letting tm collapse toward the sublane minimum.
    resident = 2 * c_pad * (D * w_bytes + 4)  # W + bias buffers
    tm = 1024
    while tm > SUBLANE and resident + 2 * tm * (D * x_bytes + c_pad * out_bytes) > budget_bytes:
        tm //= 2
    tm = min(tm, _round_up(B, SUBLANE))
    while tm > SUBLANE and pl.cdiv(B, tm) < 2:  # give the megacore >= 2 steps
        tm = _round_up(tm // 2, SUBLANE)
    return max(SUBLANE, tm)


@functools.partial(jax.jit, static_argnames=("num_class",))
def logistic_regression_forward(x, w_padded, b_padded, *, num_class):
    """x: (B, D); w_padded: (D, Cp); b_padded: (1, Cp) f32. Returns (B, num_class)."""
    B, D = x.shape
    d_w, c_pad = w_padded.shape
    assert d_w == D

    capacity = _vmem_capacity_bytes()
    vmem_limit = (capacity * 3) // 4   # 48 MiB on v7x, 96 MiB on v5e/v6e
    budget = capacity // 2             # pipelined-buffer budget

    out_dtype = x.dtype
    tm = _choose_block_b(
        B, D, c_pad,
        x_bytes=x.dtype.itemsize,
        w_bytes=w_padded.dtype.itemsize,
        out_bytes=jnp.dtype(out_dtype).itemsize,
        budget_bytes=budget,
    )
    grid_b = pl.cdiv(B, tm)  # partial last block: Pallas clips/masks the DMAs

    out = pl.pallas_call(
        _logreg_kernel,
        out_shape=jax.ShapeDtypeStruct((B, c_pad), out_dtype),
        grid_spec=pltpu.PrefetchScalarGridSpec(
            num_scalar_prefetch=0,
            grid=(grid_b,),
            in_specs=[
                pl.BlockSpec((tm, D), lambda i: (i, 0)),      # x: tiled over batch
                pl.BlockSpec((D, c_pad), lambda i: (0, 0)),   # W^T: resident (tiny)
                pl.BlockSpec((1, c_pad), lambda i: (0, 0)),   # bias: resident
            ],
            out_specs=pl.BlockSpec((tm, c_pad), lambda i: (i, 0)),
        ),
        compiler_params=pltpu.CompilerParams(
            dimension_semantics=("parallel",),   # both TCs on v7x megacore
            vmem_limit_bytes=vmem_limit,
        ),
    )(x, w_padded, b_padded)

    return out[:, :num_class]


if __name__ == "__main__":
    # Small shapes consistent with the module: batch=8, input_dim=32, num_class=2
    B, D, C = 8, 32, 2

    key = jax.random.PRNGKey(0)
    kx, kw, kb = jax.random.split(key, 3)

    x_f32 = jax.random.normal(kx, (B, D), dtype=jnp.float32)
    # PyTorch Linear parameter shapes: W (C, D), b (C,)
    bound = 1.0 / (D ** 0.5)
    weight = jax.random.uniform(kw, (C, D), minval=-bound, maxval=bound,
                                dtype=jnp.float32)
    bias = jax.random.uniform(kb, (C,), minval=-bound, maxval=bound,
                              dtype=jnp.float32)

    # Activations kept in bf16 (the kernel's MXU compute dtype) so the HBM-bound
    # x stream is half-width; the matmul still accumulates in f32.
    x = x_f32.astype(jnp.bfloat16)

    # One-time parameter prep (transpose + lane-pad + bf16 cast) at "init".
    w_padded, b_padded = prepare_params(weight, bias)

    logits = logistic_regression_forward(x, w_padded, b_padded, num_class=C)
    jax.block_until_ready(logits)

    # Reference: same bf16-rounded operands in f32 math (kernel accumulates in
    # f32; only the final bf16 store rounds).
    ref = (x.astype(jnp.float32)
           @ weight.astype(jnp.bfloat16).astype(jnp.float32).T
           + bias)
    assert logits.shape == (B, C)
    assert logits.dtype == x.dtype
    err = float(jnp.max(jnp.abs(logits.astype(jnp.float32) - ref)))
    assert err < 2e-2, f"mismatch vs reference: max abs err {err}"

    print("KERNEL_OK")
</pallas_src>

<mosaic_0001>
module attributes {stable_mosaic.version = 11 : i64} {
  func.func @_logreg_kernel(%arg0: i32, %arg1: memref<8x32xbf16, #tpu.memory_space<vmem>>, %arg2: memref<32x128xbf16, #tpu.memory_space<vmem>>, %arg3: memref<1x128xf32, #tpu.memory_space<vmem>>, %arg4: memref<8x128xbf16, #tpu.memory_space<vmem>>) attributes {dimension_semantics = [#tpu.dimension_semantics<parallel>], iteration_bounds = array<i64: 1>, scalar_prefetch = 0 : i64, scratch_operands = 0 : i64, tpu.core_type = #tpu.core_type<tc>, window_params = [{transform_indices = @transform_0, window_bounds = array<i64: 8, 32>}, {pipeline_mode = #tpu.pipeline_mode<synchronous>, transform_indices = @transform_1, window_bounds = array<i64: 32, 128>}, {pipeline_mode = #tpu.pipeline_mode<synchronous>, transform_indices = @transform_2, window_bounds = array<i64: 1, 128>}, {transform_indices = @transform_3, window_bounds = array<i64: 8, 128>}]} {
    %c0 = arith.constant 0 : index
    %c0_0 = arith.constant 0 : index
    %0 = vector.load %arg1[%c0, %c0_0] : memref<8x32xbf16, #tpu.memory_space<vmem>>, vector<8x32xbf16>
    %c0_1 = arith.constant 0 : index
    %c0_2 = arith.constant 0 : index
    %1 = vector.load %arg2[%c0_1, %c0_2] : memref<32x128xbf16, #tpu.memory_space<vmem>>, vector<32x128xbf16>
    %cst = arith.constant dense<0.000000e+00> : vector<8x128xf32>
    %2 = tpu.matmul %0, %1, %cst {dimension_numbers = #tpu.dot_dimension_numbers<[1], [0], [0], [1], [0, 0, 1, 1], [], []>} : vector<8x32xbf16>, vector<32x128xbf16>, vector<8x128xf32> -> vector<8x128xf32>
    %c0_3 = arith.constant 0 : index
    %c0_4 = arith.constant 0 : index
    %3 = vector.load %arg3[%c0_3, %c0_4] : memref<1x128xf32, #tpu.memory_space<vmem>>, vector<1x128xf32>
    %4 = vector.broadcast %3 : vector<1x128xf32> to vector<8x128xf32>
    %5 = arith.addf %2, %4 : vector<8x128xf32>
    %6 = arith.truncf %5 : vector<8x128xf32> to vector<8x128xbf16>
    %c0_5 = arith.constant 0 : index
    %c0_6 = arith.constant 0 : index
    %7 = vector.load %arg4[%c0_5, %c0_6] : memref<8x128xbf16, #tpu.memory_space<vmem>>, vector<8x128xbf16>
    tpu.vector_store %arg4[%c0_5, %c0_6], %6 {strides = array<i32>} : memref<8x128xbf16, #tpu.memory_space<vmem>>, vector<8x128xbf16>,
    return
  }
  func.func @transform_0(%arg0: i32) -> (i32, i32) {
    %c0_i32 = arith.constant 0 : i32
    %c0_i32_0 = arith.constant 0 : i32
    return %arg0, %c0_i32 : i32, i32
  }
  func.func @transform_1(%arg0: i32) -> (i32, i32) {
    %c0_i32 = arith.constant 0 : i32
    %c0_i32_0 = arith.constant 0 : i32
    %c0_i32_1 = arith.constant 0 : i32
    return %c0_i32, %c0_i32_0 : i32, i32
  }
  func.func @transform_2(%arg0: i32) -> (i32, i32) {
    %c0_i32 = arith.constant 0 : i32
    %c0_i32_0 = arith.constant 0 : i32
    %c0_i32_1 = arith.constant 0 : i32
    return %c0_i32, %c0_i32_0 : i32, i32
  }
  func.func @transform_3(%arg0: i32) -> (i32, i32) {
    %c0_i32 = arith.constant 0 : i32
    %c0_i32_0 = arith.constant 0 : i32
    return %arg0, %c0_i32 : i32, i32
  }
}

</mosaic_0001>

<bundles_post_ra>
// kernel: logistic_regression_forward.1
= control target key start
LH: loop header
LB: loop body
LE: loop exit
PB: predicated region body
PF: predicated region fallthrough
CT: control target
= control target key end

     0   :  { %8 = vsyncpa [#allocation3], 0  ;;  %s251_s0 = inlined_call_operand.hbm [shape: bf16[8,32], index: 0, kind: input, shape index: {}]   ;;  %s252_s1 = inlined_call_operand.hbm [shape: bf16[32,128], index: 1, kind: input, shape index: {}]   ;;  %s253_s2 = inlined_call_operand.vmem [shape: f32[1,128], index: 2, kind: input, shape index: {}]   ;;  %s254_s3 = inlined_call_operand.vmem [shape: bf16[8,128], index: 3, kind: output, shape index: {}]  }
   0x1   :  { %9 = vsyncpa [#allocation5], 0  ;;  %s188_s12 = smov [#allocation2]   ;;  %s189_s14 = smov [#allocation4]  }
   0x2   :  { %s16_s13 = sshll.u32 %s188_s12, 4  ;;  %s25_s15 = sshll.u32 %s189_s14, 4  ;;  %s17_s13 = int_to_ptr.vmem [resolvable:$true] %s16_s13  ;;  %s214_s15 = int_to_ptr.vmem [resolvable:$true] %s25_s15 }
   0x3   :  { %s140_s18 = scalar_lea.hbm %s251_s0, 64 }
   0x4   :  { %p141_p0 = scmp.ne.s32.totalorder %s251_s0, %s140_s18  ;;  %p144_p1 = scmp.lt.u32.totalorder %s140_s18, %s251_s0 }
   0x6   :  { %p146_p2 = pnand %p144_p1, %p141_p0 }
   0x8   :  { %149 = shalt.err (!%p146_p2)
}
   0x9   :  { %s150_s23 = scalar_lea.vmem %s17_s13, 64  ;;  %p155_p4 = scmp.lt.s32.totalorder %s17_s13, %s17_s13 }
   0xa   :  { %p151_p3 = scmp.ne.s32.totalorder %s17_s13, %s150_s23  ;;  %p156_p5 = scmp.lt.s32.totalorder %s150_s23, %s150_s23 }
   0xc   :  { %p157_p6 = por %p156_p5, %p155_p4 }
   0xe   :  { %p158_p7 = pnand %p157_p6, %p151_p3 }
  0x10   :  { %161 = shalt.err (!%p158_p7)
}
  0x11   :  { %19 = dma.hbm_to_vmem [thread:$0]  %s251_s0, 64, %s17_s13, [#allocation3]  }
  0x12   :  { %s162_s28 = scalar_lea.hbm %s252_s1, 256 }
  0x13   :  { %p163_p8 = scmp.ne.s32.totalorder %s252_s1, %s162_s28  ;;  %p166_p9 = scmp.lt.u32.totalorder %s162_s28, %s252_s1 }
  0x15   :  { %p168_p10 = pnand %p166_p9, %p163_p8 }
  0x17   :  { %171 = shalt.err (!%p168_p10)
}
  0x18   :  { %s172_s6 = scalar_lea.vmem %s214_s15, 256  ;;  %p177_p12 = scmp.lt.s32.totalorder %s214_s15, %s214_s15 }
  0x19   :  { %p173_p11 = scmp.ne.s32.totalorder %s214_s15, %s172_s6  ;;  %p178_p13 = scmp.lt.s32.totalorder %s172_s6, %s172_s6 }
  0x1b   :  { %p179_p0 = por %p178_p13, %p177_p12 }
  0x1d   :  { %p180_p1 = pnand %p179_p0, %p173_p11 }
  0x1f   :  { %183 = shalt.err (!%p180_p1)
}
  0x20   :  { %s190_s0 = smov 64   ;;  %s191_s7 = smov 4  }
  0x21   :  { %31 = dma.hbm_to_vmem [thread:$0]  %s252_s1, 256, %s214_s15, [#allocation5], %s190_s0, %s190_s0, %s191_s7  }
  0x22   :  { %184 = dma.done.wait [#allocation3], 64  }
  0x23   :  { %185 = vsyncadd [#allocation3], 4294967232 }
  0x24   :  { %186 = dma.done.wait [#allocation5], 256  }
  0x25   :  { %187 = vsyncadd [#allocation5], 4294967040  ;;  %v192_v0 = vmov 0.0   ;;  %vm193_vm0 = vmmov 0   ;;  %v138_v1 = vld [vmem:[#allocation4] sm:$0xff]   ;;  %v139_v2 = vld [vmem:[#allocation4 + $0x8] sm:$0xff]  }
  0x26   :  { %124 = vmatprep.subr.bf16.mxu0 %v192_v0  ;;  %128 = vmatprep.mubr.msk.bf16.mxu0 %vm193_vm0, %v192_v0  ;;  %v41_v3 = vld [vmem:[#allocation2] sm:$0xf]  ;;  %vm65_vm1 = vcmask 261120  }
  0x27   :  { %125 = vmatpush3.bf16.msra.mxu0 %v138_v1  ;;  %v117_v4 = vld [vmem:[%s253_s2] ss:$0 sm:$0xff] }
  0x28   :  { %126 = vmatprep.subr.bf16.mxu0 %v192_v0 }
  0x2b   :  { %127 = vmatpush3.bf16.msra.mxu0 %v139_v2 }
  0x2e   :  { %129 = vmatmul.mubr.msk.bf16.vlgmr.msra.gmra.mrb[0].mxu0 %vm65_vm1, %v41_v3 }
 0x101   :  { %v103_v5 = vpop.f32.mrb[0].mxu0 }
 0x102   :  { %v104_v6 = vadd.f32 %v117_v4, %v103_v5  ;;  %v130_v7 = vpop.f32.mrb[1].mxu0 }
 0x103   :  { %v106_v8 = vpop.f32.mrb[2].mxu0 }
 0x104   :  { %v109_v9 = vpack.c.bf16 %v104_v6, %v104_v6  ;;  %v131_v10 = vpop.f32.mrb[3].mxu0 }
 0x106   :  { %110 = vst [vmem:[%s254_s3] sm:$0xf] %v109_v9 }
 0x107   :  { %115 = vsyncpa [#allocation3], 1 }
 0x108   :  { %116 = vsyncpa [#allocation5], 1 }

</bundles_post_ra>
